<compile_context>
chip_gen: v6e
topology: v6e:2x2x1
jax: 0.10.0
libtpu: 0.0.40
codegen_flags: <defaults>
</compile_context>

<pallas_src>
import jax
import jax.numpy as jnp
from jax.experimental import pallas as pl
from jax.experimental.pallas import tpu as pltpu


# ----------------------------- configuration --------------------------------
Z_DIM_OBJ = 32                                  # stand-in for vol_generator.z_dim
Z_DIM_BG = 16                                   # stand-in for vol_generator.z_dim_bg
LATENT_DIM = Z_DIM_OBJ * 2 + Z_DIM_BG * 2       # = 96 (wrapper's latent_dim formula)
K_PAD = 128                                     # latent padded to a full lane tile
HIDDEN = 128
IMG_SIZE = 16
IMG_C = 3
OUT_FLAT = IMG_C * IMG_SIZE * IMG_SIZE          # 768, multiple of 128 (lane-dense)
B_PAD = 8                                       # batch padded to one sublane tile
TEMPERATURE = 0.7


# ------------------------------- Pallas kernel -------------------------------
def _generator_kernel(code_ref, w1_ref, w2_ref, b2_ref, img_ref):
    # code_ref: (B_PAD, K_PAD)     bf16  (temperature folded into w1, bias col = 1)
    # w1_ref:   (K_PAD, HIDDEN)    bf16  (row LATENT_DIM carries b1)
    # w2_ref:   (HIDDEN, OUT_FLAT) bf16  (pre-scaled by 2 for the tanh/post fusion)
    # b2_ref:   (1, OUT_FLAT)      f32   (pre-scaled by 2)
    # img_ref:  (B_PAD, OUT_FLAT)  f32   (post-processed image, in [0, 1])

    # latent -> hidden (MXU, bf16 inputs, f32 accumulation); bias comes from the
    # folded column, so only ReLU remains on the VPU.
    h = jnp.dot(code_ref[...], w1_ref[...], preferred_element_type=jnp.float32)
    h = jnp.maximum(h, 0.0).astype(jnp.bfloat16)

    # hidden -> pixels (MXU) with fused tanh + post-process:
    #   (tanh(x) + 1) / 2 == sigmoid(2x); the 2x lives in w2/b2, so this is a
    #   single EUP op per element with no extra VPU multiply.
    raw = jnp.dot(h, w2_ref[...], preferred_element_type=jnp.float32)
    img_ref[...] = jax.nn.sigmoid(raw + b2_ref[...])


# ------------------------------- wrapper (glue) -------------------------------
def giraffehd_forward(z, params):
    """JAX/Pallas equivalent of GIRAFFEHDWrapper.forward.

    z: (B, LATENT_DIM) float32
    returns: (B, 3, IMG_SIZE, IMG_SIZE) float32 in [0, 1]  (NCHW)
    """
    B = z.shape[0]
    assert z.shape[1] == LATENT_DIM

    # The PyTorch wrapper's split of z into (z_shape_obj, z_app_obj, z_shape_bg,
    # z_app_bg) reconstructs z exactly when re-concatenated, and the temperature
    # scale is folded into w1, so z is fed straight to the kernel.

    # Pad batch to a sublane tile and K to a lane tile; column LATENT_DIM is the
    # bias-fold column (set to 1 for real rows).  Padded rows get 0 -> h = 0.
    code = jnp.zeros((B_PAD, K_PAD), jnp.bfloat16)
    code = code.at[:B, :LATENT_DIM].set(z.astype(jnp.bfloat16))
    code = code.at[:B, LATENT_DIM].set(jnp.bfloat16(1.0))

    w1, w2, b2 = params  # temperature + b1 folded into w1; 2x folded into w2/b2

    # Everything fits comfortably in VMEM (~253 KiB total), so run a single
    # grid-less invocation with whole-array VMEM-resident operands.
    cost = pl.CostEstimate(
        flops=2 * B_PAD * K_PAD * HIDDEN + 2 * B_PAD * HIDDEN * OUT_FLAT,
        transcendentals=B_PAD * OUT_FLAT,
        bytes_accessed=(B_PAD * K_PAD * 2          # code  (bf16)
                        + K_PAD * HIDDEN * 2       # w1    (bf16)
                        + HIDDEN * OUT_FLAT * 2    # w2    (bf16)
                        + OUT_FLAT * 4             # b2    (f32)
                        + B_PAD * OUT_FLAT * 4),   # out   (f32)
    )

    flat = pl.pallas_call(
        _generator_kernel,
        out_shape=jax.ShapeDtypeStruct((B_PAD, OUT_FLAT), jnp.float32),
        in_specs=[
            pl.BlockSpec(memory_space=pltpu.MemorySpace.VMEM),  # code
            pl.BlockSpec(memory_space=pltpu.MemorySpace.VMEM),  # w1
            pl.BlockSpec(memory_space=pltpu.MemorySpace.VMEM),  # w2
            pl.BlockSpec(memory_space=pltpu.MemorySpace.VMEM),  # b2
        ],
        out_specs=pl.BlockSpec(memory_space=pltpu.MemorySpace.VMEM),
        cost_estimate=cost,
    )(code, w1, w2, b2)

    # drop batch padding; flat is row-major (B, C*H*W) -> NCHW
    return flat[:B].reshape(B, IMG_C, IMG_SIZE, IMG_SIZE)


def init_params(key, temperature=TEMPERATURE):
    """Deterministic synthetic generator parameters with all constant folds applied.

    * temperature folded into w1,
    * b1 folded into w1 row LATENT_DIM (consumed by the bias column of `code`),
    * the post-process 2x scale folded into w2 and b2.
    """
    k1, k2, k3, k4 = jax.random.split(key, 4)

    w1 = jax.random.normal(k1, (LATENT_DIM, HIDDEN), jnp.float32) * 0.05
    w1 = w1 * temperature                                        # fold temperature
    b1 = jax.random.normal(k3, (HIDDEN,), jnp.float32) * 0.01
    w1_full = jnp.zeros((K_PAD, HIDDEN), jnp.float32)
    w1_full = w1_full.at[:LATENT_DIM].set(w1)
    w1_full = w1_full.at[LATENT_DIM].set(b1)                     # fold b1
    w1_full = w1_full.astype(jnp.bfloat16)

    w2 = jax.random.normal(k2, (HIDDEN, OUT_FLAT), jnp.float32) * 0.05
    b2 = jax.random.normal(k4, (1, OUT_FLAT), jnp.float32) * 0.01
    w2 = (w2 * 2.0).astype(jnp.bfloat16)                         # fold 2x (sigmoid(2x))
    b2 = (b2 * 2.0).astype(jnp.float32)

    return w1_full, w2, b2


# ----------------------------------- main -------------------------------------
if __name__ == "__main__":
    key = jax.random.PRNGKey(0)
    k_param, k_z = jax.random.split(key)

    params = init_params(k_param)
    z = jax.random.normal(k_z, (2, LATENT_DIM), jnp.float32)   # batch = 2

    img = giraffehd_forward(z, params)
    img = jax.block_until_ready(img)

    assert img.shape == (2, IMG_C, IMG_SIZE, IMG_SIZE)
    assert img.dtype == jnp.float32
    # post-processed image must land in [0, 1] (sigmoid output)
    assert bool(jnp.all(img >= 0.0)) and bool(jnp.all(img <= 1.0))

    print("KERNEL_OK")
</pallas_src>

<mosaic_0001>
module attributes {stable_mosaic.version = 11 : i64} {
  func.func @_generator_kernel(%arg0: memref<8x128xbf16, #tpu.memory_space<vmem>>, %arg1: memref<128x128xbf16, #tpu.memory_space<vmem>>, %arg2: memref<128x768xbf16, #tpu.memory_space<vmem>>, %arg3: memref<1x768xf32, #tpu.memory_space<vmem>>, %arg4: memref<8x768xf32, #tpu.memory_space<vmem>>) attributes {dimension_semantics = [], scalar_prefetch = 0 : i64, scratch_operands = 0 : i64, tpu.core_type = #tpu.core_type<tc>} {
    %c0 = arith.constant 0 : index
    %c0_0 = arith.constant 0 : index
    %0 = vector.load %arg0[%c0, %c0_0] : memref<8x128xbf16, #tpu.memory_space<vmem>>, vector<8x128xbf16>
    %c0_1 = arith.constant 0 : index
    %c0_2 = arith.constant 0 : index
    %1 = vector.load %arg1[%c0_1, %c0_2] : memref<128x128xbf16, #tpu.memory_space<vmem>>, vector<128x128xbf16>
    %cst = arith.constant dense<0.000000e+00> : vector<8x128xf32>
    %2 = tpu.matmul %0, %1, %cst {dimension_numbers = #tpu.dot_dimension_numbers<[1], [0], [0], [1], [0, 0, 1, 1], [], []>} : vector<8x128xbf16>, vector<128x128xbf16>, vector<8x128xf32> -> vector<8x128xf32>
    %cst_3 = arith.constant 0.000000e+00 : f32
    %3 = vector.broadcast %cst_3 : f32 to vector<8x128xf32>
    %4 = arith.maximumf %2, %3 : vector<8x128xf32>
    %5 = arith.truncf %4 : vector<8x128xf32> to vector<8x128xbf16>
    %c0_4 = arith.constant 0 : index
    %c0_5 = arith.constant 0 : index
    %6 = vector.load %arg2[%c0_4, %c0_5] : memref<128x768xbf16, #tpu.memory_space<vmem>>, vector<128x768xbf16>
    %cst_6 = arith.constant dense<0.000000e+00> : vector<8x768xf32>
    %7 = tpu.matmul %5, %6, %cst_6 {dimension_numbers = #tpu.dot_dimension_numbers<[1], [0], [0], [1], [0, 0, 1, 1], [], []>} : vector<8x128xbf16>, vector<128x768xbf16>, vector<8x768xf32> -> vector<8x768xf32>
    %c0_7 = arith.constant 0 : index
    %c0_8 = arith.constant 0 : index
    %8 = vector.load %arg3[%c0_7, %c0_8] : memref<1x768xf32, #tpu.memory_space<vmem>>, vector<1x768xf32>
    %9 = vector.broadcast %8 : vector<1x768xf32> to vector<8x768xf32>
    %10 = arith.addf %7, %9 : vector<8x768xf32>
    %11 = arith.negf %10 : vector<8x768xf32>
    %12 = math.exp %11 : vector<8x768xf32>
    %cst_9 = arith.constant 1.000000e+00 : f32
    %13 = vector.broadcast %cst_9 : f32 to vector<8x768xf32>
    %14 = arith.addf %13, %12 : vector<8x768xf32>
    %15 = arith.divf %13, %14 : vector<8x768xf32>
    %c0_10 = arith.constant 0 : index
    %c0_11 = arith.constant 0 : index
    %16 = vector.load %arg4[%c0_10, %c0_11] : memref<8x768xf32, #tpu.memory_space<vmem>>, vector<8x768xf32>
    tpu.vector_store %arg4[%c0_10, %c0_11], %15 {strides = array<i32>} : memref<8x768xf32, #tpu.memory_space<vmem>>, vector<8x768xf32>,
    return
  }
}

</mosaic_0001>

<bundles_post_ra>
// kernel: tpu_custom_call.1
= control target key start
LH: loop header
LB: loop body
LE: loop exit
PB: predicated region body
PF: predicated region fallthrough
CT: control target
= control target key end

     0   :  { %9 = vsyncpa [#allocation3], 0  ;;  %s1046_s0 = inlined_call_operand.hbm [shape: bf16[8,128], index: 0, kind: input, shape index: {}]   ;;  %s1047_s1 = inlined_call_operand.hbm [shape: bf16[128,128], index: 1, kind: input, shape index: {}]   ;;  %s1048_s2 = inlined_call_operand.hbm [shape: bf16[128,768], index: 2, kind: input, shape index: {}]   ;;  %s1049_s3 = inlined_call_operand.hbm [shape: f32[1,768], index: 3, kind: input, shape index: {}]   ;;  %s1050_s4 = inlined_call_operand.hbm [shape: f32[8,768], index: 4, kind: output, shape index: {}]  }
   0x1   :  { %10 = vsyncpa [#allocation6], 0 }
   0x2   :  { %11 = vsyncpa [#allocation9], 0 }
   0x3   :  { %12 = vsyncpa [#allocation4], 0  ;;  %s994_s15 = smov [#allocation5]  }
   0x4   :  { %s28_s16 = sshll.u32 %s994_s15, 4  ;;  %s29_s16 = int_to_ptr.vmem [resolvable:$true] %s28_s16 }
   0x5   :  { %s894_s17 = scalar_lea.vmem %s29_s16, 1024  ;;  %p899_p1 = scmp.lt.s32.totalorder %s29_s16, %s29_s16 }
   0x6   :  { %p895_p0 = scmp.ne.s32.totalorder %s29_s16, %s894_s17  ;;  %p900_p2 = scmp.lt.s32.totalorder %s894_s17, %s894_s17 }
   0x8   :  { %p901_p3 = por %p900_p2, %p899_p1 }
   0xa   :  { %p902_p4 = pnand %p901_p3, %p895_p0 }
   0xc   :  { %905 = shalt.err (!%p902_p4)
}
   0xd   :  { %s995_s18 = smov 64   ;;  %s996_s19 = smov 4  }
   0xe   :  { %34 = dma.hbm_to_vmem [thread:$0]  %s1047_s1, 1024, %s29_s16, [#allocation6], %s995_s18, %s995_s18, %s996_s19  }
   0xf   :  { %s997_s22 = smov [#allocation2]   ;;  %s998_s24 = smov [#allocation7]  }
  0x10   :  { %s19_s23 = sshll.u32 %s997_s22, 4  ;;  %s40_s25 = sshll.u32 %s998_s24, 4  ;;  %s20_s23 = int_to_ptr.vmem [resolvable:$true] %s19_s23  ;;  %s41_s25 = int_to_ptr.vmem [resolvable:$true] %s40_s25 }
  0x11   :  { %s914_s26 = scalar_lea.vmem %s20_s23, 64  ;;  %p919_p6 = scmp.lt.s32.totalorder %s20_s23, %s20_s23 }
  0x12   :  { %p915_p5 = scmp.ne.s32.totalorder %s20_s23, %s914_s26  ;;  %p920_p7 = scmp.lt.s32.totalorder %s914_s26, %s914_s26 }
  0x14   :  { %p921_p8 = por %p920_p7, %p919_p6 }
  0x16   :  { %p922_p9 = pnand %p921_p8, %p915_p5 }
  0x18   :  { %925 = shalt.err (!%p922_p9)
}
  0x19   :  { %22 = dma.hbm_to_vmem [thread:$0]  %s1046_s0, 64, %s20_s23, [#allocation3]  }
  0x1a   :  { %s934_s29 = scalar_lea.vmem %s41_s25, 6144  ;;  %p939_p11 = scmp.lt.s32.totalorder %s41_s25, %s41_s25 }
  0x1b   :  { %p935_p10 = scmp.ne.s32.totalorder %s41_s25, %s934_s29  ;;  %p940_p12 = scmp.lt.s32.totalorder %s934_s29, %s934_s29 }
  0x1d   :  { %p941_p13 = por %p940_p12, %p939_p11 }
  0x1f   :  { %p942_p0 = pnand %p941_p13, %p935_p10 }
  0x21   :  { %945 = shalt.err (!%p942_p0)
}
  0x22   :  { %s999_s1 = smov 384   ;;  %s1000_s30 = smov 24  }
  0x23   :  { %46 = dma.hbm_to_vmem [thread:$0]  %s1048_s2, 6144, %s41_s25, [#allocation6], %s999_s1, %s999_s1, %s1000_s30  }
  0x24   :  { %s1001_s7 = smov [#allocation8]  }
  0x25   :  { %s53_s8 = sshll.u32 %s1001_s7, 4  ;;  %s54_s8 = int_to_ptr.vmem [resolvable:$true] %s53_s8 }
  0x26   :  { %s954_s9 = scalar_lea.vmem %s54_s8, 96  ;;  %p959_p2 = scmp.lt.s32.totalorder %s54_s8, %s54_s8 }
  0x27   :  { %p955_p1 = scmp.ne.s32.totalorder %s54_s8, %s954_s9  ;;  %p960_p3 = scmp.lt.s32.totalorder %s954_s9, %s954_s9 }
  0x29   :  { %p961_p4 = por %p960_p3, %p959_p2 }
  0x2b   :  { %p962_p5 = pnand %p961_p4, %p955_p1 }
  0x2d   :  { %965 = shalt.err (!%p962_p5)
}
  0x2e   :  { %56 = dma.hbm_to_vmem [thread:$0]  %s1049_s3, 96, %s54_s8, [#allocation9]  }
  0x2f   :  { %986 = dma.done.wait [#allocation3], 64  }
  0x30   :  { %987 = vsyncadd [#allocation3], 4294967232 }
  0x31   :  { %988 = dma.done.wait [#allocation6], 7168  }
  0x32   :  { %989 = vsyncadd [#allocation6], 4294960128 }
  0x33   :  { %990 = dma.done.wait [#allocation9], 96  }
  0x34   :  { %991 = vsyncadd [#allocation9], 4294967200  ;;  %v1002_v0 = vmov 0.0   ;;  %vm1003_vm0 = vmmov 0   ;;  %v782_v1 = vld [vmem:[#allocation5 + $0x38] sm:$0xff]   ;;  %v783_v2 = vld [vmem:[#allocation5 + $0x30] sm:$0xff]  }
  0x35   :  { %750 = vmatprep.subr.bf16.mxu0 %v1002_v0  ;;  %766 = vmatprep.mubr.msk.bf16.mxu0 %vm1003_vm0, %v1002_v0  ;;  %v784_v3 = vld [vmem:[#allocation5 + $0x28] sm:$0xff]   ;;  %v785_v6 = vld [vmem:[#allocation5 + $0x20] sm:$0xff]   ;;  %v786_v9 = vld [vmem:[#allocation5 + $0x18] sm:$0xff]   ;;  %v1004_v43 = vmov 0   ;;  %s1005_s2 = smov [#allocation10]  }
  0x36   :  { %751 = vmatpush3.bf16.msra.mxu0 %v782_v1  ;;  %v790_v4 = vld [vmem:[#allocation7 + $0x154] ss:$24 sps:$4 sm:$0xff]   ;;  %v792_v5 = vld [vmem:[#allocation7 + $0x150] ss:$24 sps:$4 sm:$0xff]   ;;  %v796_v7 = vld [vmem:[#allocation7 + $0x124] ss:$24 sps:$4 sm:$0xff]   ;;  %529 = vmatprep.mubr.bf16.mxu1 %v1004_v43  ;;  %v227_v1 = vlaneseq }
  0x37   :  { %752 = vmatprep.subr.bf16.mxu0 %v1002_v0  ;;  %497 = vmatprep.subr.bf16.mxu1 %v790_v4  ;;  %v798_v8 = vld [vmem:[#allocation7 + $0x120] ss:$24 sps:$4 sm:$0xff]   ;;  %v802_v10 = vld [vmem:[#allocation7 + $0xf4] ss:$24 sps:$4 sm:$0xff]   ;;  %v804_v11 = vld [vmem:[#allocation7 + $0xf0] ss:$24 sps:$4 sm:$0xff]  }
  0x38   :  { %498 = vmatpush1.bf16.msra.mxu1 %v792_v5  ;;  %v808_v12 = vld [vmem:[#allocation7 + $0xc4] ss:$24 sps:$4 sm:$0xff]   ;;  %v787_v13 = vld [vmem:[#allocation5 + $0x10] sm:$0xff]   ;;  %v810_v14 = vld [vmem:[#allocation7 + $0xc0] ss:$24 sps:$4 sm:$0xff]   ;;  %s668_s3 = sshll.u32 %s1005_s2, 4  ;;  %s669_s3 = int_to_ptr.vmem [resolvable:$true] %s668_s3 }
  0x39   :  { %499 = vmatprep.subr.bf16.mxu1 %v796_v7  ;;  %v814_v15 = vld [vmem:[#allocation7 + $0x94] ss:$24 sps:$4 sm:$0xff]   ;;  %v816_v17 = vld [vmem:[#allocation7 + $0x90] ss:$24 sps:$4 sm:$0xff]   ;;  %v789_v18 = vld [vmem:[#allocation5] sm:$0xff]   ;;  %s966_s11 = scalar_lea.vmem %s669_s3, 768  ;;  %p971_p7 = scmp.lt.s32.totalorder %s669_s3, %s669_s3 }
  0x3a   :  { %753 = vmatpush3.bf16.msra.mxu0 %v783_v2  ;;  %v788_v16 = vld [vmem:[#allocation5 + $0x8] sm:$0xff]   ;;  %v820_v19 = vld [vmem:[#allocation7 + $0x64] ss:$24 sps:$4 sm:$0xff]   ;;  %v822_v21 = vld [vmem:[#allocation7 + $0x60] ss:$24 sps:$4 sm:$0xff]   ;;  %v228_v2 = vshrl.u32 %v227_v1, 7  ;;  %p967_p6 = scmp.ne.s32.totalorder %s669_s3, %s966_s11  ;;  %p972_p8 = scmp.lt.s32.totalorder %s966_s11, %s966_s11 }
  0x3b   :  { %754 = vmatprep.subr.bf16.mxu0 %v1002_v0  ;;  %v795_v20 = vld [vmem:[#allocation7 + $0x15c] ss:$24 sps:$4 sm:$0xff]   ;;  %v793_v24 = vld [vmem:[#allocation7 + $0x158] ss:$24 sps:$4 sm:$0xff]   ;;  %v801_v25 = vld [vmem:[#allocation7 + $0x12c] ss:$24 sps:$4 sm:$0xff]  }
  0x3c   :  { %500 = vmatpush1.bf16.msra.mxu1 %v798_v8  ;;  %v826_v22 = vld [vmem:[#allocation7 + $0x34] ss:$24 sps:$4 sm:$0xff]   ;;  %v70_v23 = vld [vmem:[#allocation2] sm:$0xf]  ;;  %v828_v26 = vld [vmem:[#allocation7 + $0x30] ss:$24 sps:$4 sm:$0xff]   ;;  %p973_p9 = por %p972_p8, %p971_p7 }
  0x3d   :  { %501 = vmatprep.subr.bf16.mxu1 %v802_v10  ;;  %v799_v27 = vld [vmem:[#allocation7 + $0x128] ss:$24 sps:$4 sm:$0xff]   ;;  %v807_v28 = vld [vmem:[#allocation7 + $0xfc] ss:$24 sps:$4 sm:$0xff]   ;;  %v805_v29 = vld [vmem:[#allocation7 + $0xf8] ss:$24 sps:$4 sm:$0xff]  }
  0x3e   :  { %755 = vmatpush3.bf16.msra.mxu0 %v784_v3  ;;  %v813_v30 = vld [vmem:[#allocation7 + $0xcc] ss:$24 sps:$4 sm:$0xff]   ;;  %v811_v31 = vld [vmem:[#allocation7 + $0xc8] ss:$24 sps:$4 sm:$0xff]   ;;  %v819_v32 = vld [vmem:[#allocation7 + $0x9c] ss:$24 sps:$4 sm:$0xff]   ;;  %p974_p10 = pnand %p973_p9, %p967_p6 }
  0x3f   :  { %756 = vmatprep.subr.bf16.mxu0 %v1002_v0  ;;  %v817_v33 = vld [vmem:[#allocation7 + $0x98] ss:$24 sps:$4 sm:$0xff]   ;;  %v825_v34 = vld [vmem:[#allocation7 + $0x6c] ss:$24 sps:$4 sm:$0xff]   ;;  %v823_v35 = vld [vmem:[#allocation7 + $0x68] ss:$24 sps:$4 sm:$0xff]  }
  0x40   :  { %502 = vmatpush1.bf16.msra.mxu1 %v804_v11  ;;  %v831_v36 = vld [vmem:[#allocation7 + $0x3c] ss:$24 sps:$4 sm:$0xff]   ;;  %v829_v37 = vld [vmem:[#allocation7 + $0x38] ss:$24 sps:$4 sm:$0xff]   ;;  %v837_v40 = vld [vmem:[#allocation7 + $0xc] ss:$24 sps:$4 sm:$0xff]  }
  0x41   :  { %503 = vmatprep.subr.bf16.mxu1 %v808_v12  ;;  %v832_v38 = vld [vmem:[#allocation7 + $0x4] ss:$24 sps:$4 sm:$0xff]   ;;  %v834_v39 = vld [vmem:[#allocation7] ss:$24 sps:$4 sm:$0xff]   ;;  %v843_v49 = vld [vmem:[#allocation7 + $0x134] ss:$24 sps:$4 sm:$0xff]  }
  0x42   :  { %757 = vmatpush3.bf16.msra.mxu0 %v785_v6  ;;  %v835_v41 = vld [vmem:[#allocation7 + $0x8] ss:$24 sps:$4 sm:$0xff]   ;;  %v840_v42 = vld [vmem:[#allocation7 + $0x164] ss:$24 sps:$4 sm:$0xff]   ;;  %v849_v55 = vld [vmem:[#allocation7 + $0xd4] ss:$24 sps:$4 sm:$0xff]  }
  0x43   :  { %758 = vmatprep.subr.bf16.mxu0 %v1002_v0  ;;  %v838_v47 = vld [vmem:[#allocation7 + $0x160] ss:$24 sps:$4 sm:$0xff]   ;;  %v841_v52 = vld [vmem:[#allocation7 + $0x130] ss:$24 sps:$4 sm:$0xff]   ;;  %v846_v53 = vld [vmem:[#allocation7 + $0x104] ss:$24 sps:$4 sm:$0xff]  }
  0x44   :  { %504 = vmatpush1.bf16.msra.mxu1 %v810_v14  ;;  %v844_v54 = vld [vmem:[#allocation7 + $0x100] ss:$24 sps:$4 sm:$0xff]   ;;  %v847_v56 = vld [vmem:[#allocation7 + $0xd0] ss:$24 sps:$4 sm:$0xff]   ;;  %v852_v57 = vld [vmem:[#allocation7 + $0xa4] ss:$24 sps:$4 sm:$0xff]  }
  0x45   :  { %505 = vmatprep.subr.bf16.mxu1 %v814_v15  ;;  %v850_v58 = vld [vmem:[#allocation7 + $0xa0] ss:$24 sps:$4 sm:$0xff]   ;;  %v855_v59 = vld [vmem:[#allocation7 + $0x74] ss:$24 sps:$4 sm:$0xff]   ;;  %v853_v60 = vld [vmem:[#allocation7 + $0x70] ss:$24 sps:$4 sm:$0xff]  }
  0x46   :  { %759 = vmatpush3.bf16.msra.mxu0 %v786_v9  ;;  %v858_v61 = vld [vmem:[#allocation7 + $0x44] ss:$24 sps:$4 sm:$0xff]   ;;  %v856_v62 = vld [vmem:[#allocation7 + $0x40] ss:$24 sps:$4 sm:$0xff]   ;;  %v861_v63 = vld [vmem:[#allocation7 + $0x14] ss:$24 sps:$4 sm:$0xff]  }
  0x47   :  { %760 = vmatprep.subr.bf16.mxu0 %v1002_v0  ;;  %v229_v3 = vsub.s32 0, %v228_v2  ;;  %v237_v4 = vsub.s32 2, %v228_v2  ;;  %v225_v5 = vld [vmem:[#allocation8] sm:$0x3f]  ;;  %v233_v6 = vsub.s32 1, %v228_v2  ;;  %v241_v7 = vsub.s32 3, %v228_v2 }
  0x48   :  { %506 = vmatpush1.bf16.msra.mxu1 %v816_v17 }
  0x49   :  { %507 = vmatprep.subr.bf16.mxu1 %v820_v19  ;;  %v230_v8 = vrot.slane %v225_v5, %v229_v3  ;;  %v238_v9 = vrot.slane %v225_v5, %v237_v4  ;;  %v234_v10 = vrot.slane %v225_v5, %v233_v6  ;;  %v242_v11 = vrot.slane %v225_v5, %v241_v7 }
  0x4a   :  { %761 = vmatpush3.bf16.msra.mxu0 %v787_v13 }
  0x4b   :  { %762 = vmatprep.subr.bf16.mxu0 %v1002_v0 }
  0x4c   :  { %508 = vmatpush1.bf16.msra.mxu1 %v822_v21 }
  0x4d   :  { %509 = vmatprep.subr.bf16.mxu1 %v826_v22 }
  0x4e   :  { %763 = vmatpush3.bf16.msra.mxu0 %v788_v16 }
  0x4f   :  { %764 = vmatprep.subr.bf16.mxu0 %v1002_v0  ;;  %v859_v0 = vld [vmem:[#allocation7 + $0x10] ss:$24 sps:$4 sm:$0xff]  }
  0x50   :  { %510 = vmatpush1.bf16.msra.mxu1 %v828_v26 }
  0x51   :  { %511 = vmatprep.subr.bf16.mxu1 %v832_v38 }
  0x52   :  { %765 = vmatpush3.bf16.msra.mxu0 %v789_v18 }
  0x53   :  { %538 = vmatprep.subr.bf16.mxu0 %v795_v20 }
  0x54   :  { %512 = vmatpush1.bf16.msra.mxu1 %v834_v39 }
  0x55   :  { %767 = vmatmul.mubr.bf16.vlgmr.msra.gmra.mxu0 %v70_v23  ;;  %579 = vmatprep.subr.bf16.mxu1 %v840_v42 }
  0x56   :  { %539 = vmatpush1.bf16.msra.mxu0 %v793_v24  ;;  %570 = vmatprep.mubr.bf16.mxu0 %v1004_v43 }
  0x57   :  { %540 = vmatprep.subr.bf16.mxu0 %v801_v25 }
  0x5a   :  { %541 = vmatpush1.bf16.msra.mxu0 %v799_v27 }
  0x5b   :  { %542 = vmatprep.subr.bf16.mxu0 %v807_v28 }
  0x5e   :  { %543 = vmatpush1.bf16.msra.mxu0 %v805_v29 }
  0x5f   :  { %544 = vmatprep.subr.bf16.mxu0 %v813_v30 }
  0x62   :  { %545 = vmatpush1.bf16.msra.mxu0 %v811_v31 }
  0x63   :  { %546 = vmatprep.subr.bf16.mxu0 %v819_v32 }
  0x66   :  { %547 = vmatpush1.bf16.msra.mxu0 %v817_v33 }
  0x67   :  { %548 = vmatprep.subr.bf16.mxu0 %v825_v34 }
  0x6a   :  { %549 = vmatpush1.bf16.msra.mxu0 %v823_v35 }
  0x6b   :  { %550 = vmatprep.subr.bf16.mxu0 %v831_v36  ;;  %v245_v36 = vsub.s32 4, %v228_v2 }
  0x6d   :  { %v246_v38 = vrot.slane %v225_v5, %v245_v36 }
  0x6e   :  { %551 = vmatpush1.bf16.msra.mxu0 %v829_v37  ;;  %v249_v37 = vsub.s32 5, %v228_v2 }
  0x6f   :  { %552 = vmatprep.subr.bf16.mxu0 %v837_v40 }
  0x70   :  { %v250_v39 = vrot.slane %v225_v5, %v249_v37 }
  0x72   :  { %553 = vmatpush1.bf16.msra.mxu0 %v835_v41 }
 0x115   :  { %v169_v44 = vpop.f32.mrf.mxu0 }
 0x116   :  { %v175_v45 = vmax.f32 %v169_v44, 0.0 }
 0x117   :  { %v768_v46 = vpop.f32.mrf.mxu0 }
 0x118   :  { %v176_v48 = vpack.c.bf16 %v175_v45, %v175_v45 }
 0x119   :  { %v172_v50 = vpop.f32.mrf.mxu0 }
 0x11a   :  { %530 = vmatmul.mubr.bf16.vlgmr.msra.gmra.mxu1 %v176_v48  ;;  %571 = vmatmul.mubr.bf16.vlgmr.msra.gmra.mxu0 %v176_v48 }
 0x11b   :  { %580 = vmatpush1.bf16.msra.mxu1 %v838_v47  ;;  %v769_v51 = vpop.f32.mrf.mxu0  ;;  %611 = vmatprep.mubr.bf16.mxu1 %v1004_v43 }
 0x11c   :  { %581 = vmatprep.subr.bf16.mxu1 %v843_v49 }
 0x11f   :  { %582 = vmatpush1.bf16.msra.mxu1 %v841_v52 }
 0x120   :  { %583 = vmatprep.subr.bf16.mxu1 %v846_v53 }
 0x123   :  { %584 = vmatpush1.bf16.msra.mxu1 %v844_v54 }
 0x124   :  { %585 = vmatprep.subr.bf16.mxu1 %v849_v55 }
 0x127   :  { %586 = vmatpush1.bf16.msra.mxu1 %v847_v56 }
 0x128   :  { %587 = vmatprep.subr.bf16.mxu1 %v852_v57 }
 0x12b   :  { %588 = vmatpush1.bf16.msra.mxu1 %v850_v58 }
 0x12c   :  { %589 = vmatprep.subr.bf16.mxu1 %v855_v59 }
 0x12f   :  { %590 = vmatpush1.bf16.msra.mxu1 %v853_v60 }
 0x130   :  { %591 = vmatprep.subr.bf16.mxu1 %v858_v61 }
 0x133   :  { %592 = vmatpush1.bf16.msra.mxu1 %v856_v62 }
 0x134   :  { %593 = vmatprep.subr.bf16.mxu1 %v861_v63 }
 0x137   :  { %594 = vmatpush1.bf16.msra.mxu1 %v859_v0 }
 0x13a   :  { %612 = vmatmul.mubr.bf16.vlgmr.msra.gmra.mxu1 %v176_v48 }
 0x1da   :  { %v531_v12 = vpop.f32.mrf.mxu1  ;;  %v572_v13 = vpop.f32.mrf.mxu0 }
 0x1db   :  { %v532_v14 = vadd.f32 %v531_v12, %v230_v8  ;;  %v573_v15 = vadd.f32 %v572_v13, %v238_v9 }
 0x1dc   :  { %v533_v16 = vpop.f32.mrf.mxu1  ;;  %v574_v17 = vpop.f32.mrf.mxu0 }
 0x1dd   :  { %v735_v18 = vmul.f32 -1.442695, %v532_v14  ;;  %v737_v19 = vmul.f32 -1.442695, %v573_v15  ;;  %v534_v20 = vadd.f32 %v533_v16, %v234_v10  ;;  %v575_v21 = vadd.f32 %v574_v17, %v242_v11 }
 0x1de   :  { %v535_v22 = vpop.f32.mrf.mxu1  ;;  %v576_v23 = vpop.f32.mrf.mxu0 }
 0x1df   :  { %862 = vpow2.f32 %v735_v18  ;;  %v736_v24 = vmul.f32 -1.442695, %v534_v20  ;;  %v738_v25 = vmul.f32 -1.442695, %v575_v21 }
 0x1e0   :  { %864 = vpow2.f32 %v737_v19  ;;  %v536_v26 = vpop.f32.mrf.mxu1  ;;  %v577_v27 = vpop.f32.mrf.mxu0 }
 0x1e1   :  { %866 = vpow2.f32 %v736_v24 }
 0x1e2   :  { %868 = vpow2.f32 %v738_v25 }
 0x1ec   :  { %v863_v28 = vpop.eup %862 }
 0x1ed   :  { %v865_v29 = vpop.eup %864  ;;  %v638_v30 = vadd.f32 1.0, %v863_v28 }
 0x1ee   :  { %v867_v31 = vpop.eup %866  ;;  %v640_v32 = vadd.f32 1.0, %v865_v29 }
 0x1ef   :  { %v869_v33 = vpop.eup %868  ;;  %870 = vrcp.f32 %v638_v30  ;;  %v639_v34 = vadd.f32 1.0, %v867_v31 }
 0x1f0   :  { %872 = vrcp.f32 %v640_v32  ;;  %v641_v35 = vadd.f32 1.0, %v869_v33 }
 0x1f1   :  { %874 = vrcp.f32 %v639_v34 }
 0x1f2   :  { %876 = vrcp.f32 %v641_v35 }
 0x1fa   :  { %v613_v40 = vpop.f32.mrf.mxu1 }
 0x1fb   :  { %v614_v41 = vadd.f32 %v613_v40, %v246_v38 }
 0x1fc   :  { %v871_v42 = vpop.eup %870  ;;  %v615_v43 = vpop.f32.mrf.mxu1 }
 0x1fd   :  { %v873_v44 = vpop.eup %872  ;;  %656 = vst [vmem:[#allocation10] sm:$0xff] %v871_v42  ;;  %v739_v45 = vmul.f32 -1.442695, %v614_v41  ;;  %v616_v46 = vadd.f32 %v615_v43, %v250_v39 }
 0x1fe   :  { %v875_v47 = vpop.eup %874  ;;  %658 = vst [vmem:[#allocation10 + $0x10] sm:$0xff] %v873_v44  ;;  %v617_v48 = vpop.f32.mrf.mxu1 }
 0x1ff   :  { %v877_v49 = vpop.eup %876  ;;  %657 = vst [vmem:[#allocation10 + $0x8] sm:$0xff] %v875_v47  ;;  %878 = vpow2.f32 %v739_v45  ;;  %v740_v50 = vmul.f32 -1.442695, %v616_v46 }
 0x200   :  { %659 = vst [vmem:[#allocation10 + $0x18] sm:$0xff] %v877_v49  ;;  %v618_v51 = vpop.f32.mrf.mxu1 }
 0x201   :  { %880 = vpow2.f32 %v740_v50 }
 0x20c   :  { %v879_v52 = vpop.eup %878 }
 0x20d   :  { %v642_v53 = vadd.f32 1.0, %v879_v52 }
 0x20e   :  { %v881_v54 = vpop.eup %880 }
 0x20f   :  { %882 = vrcp.f32 %v642_v53  ;;  %v643_v55 = vadd.f32 1.0, %v881_v54 }
 0x211   :  { %884 = vrcp.f32 %v643_v55 }
 0x21c   :  { %v883_v56 = vpop.eup %882 }
 0x21d   :  { %660 = vst [vmem:[#allocation10 + $0x20] sm:$0xff] %v883_v56 }
 0x21e   :  { %v885_v57 = vpop.eup %884 }
 0x21f   :  { %661 = vst [vmem:[#allocation10 + $0x28] sm:$0xff] %v885_v57 }
 0x220   :  { %977 = shalt.err (!%p974_p10)
}
 0x221   :  { %671 = dma.vmem_to_hbm [thread:$0]  %s669_s3, 768, %s1050_s4, [#allocation4]  }
 0x222   :  { %992 = dma.done.wait [#allocation4], 768  }
 0x223   :  { %993 = vsyncadd [#allocation4], 4294966528 }
 0x224   :  { %675 = vsyncpa [#allocation3], 1 }
 0x225   :  { %676 = vsyncpa [#allocation6], 1 }
 0x226   :  { %677 = vsyncpa [#allocation9], 1 }
 0x227   :  { %678 = vsyncpa [#allocation4], 1 }

</bundles_post_ra>
